<compile_context>
chip_gen: v5e
topology: v5e:2x2
jax: 0.10.0
libtpu: 0.0.40
codegen_flags: <defaults>
</compile_context>

<pallas_src>
import functools

import jax
import jax.numpy as jnp
from jax.experimental import pallas as pl
from jax.experimental.pallas import tpu as pltpu

LANES = 128
MAX_TILE_ROWS = 2048        # 2048 x 128 f32 = 1 MiB per input tile
NUM_CORE_SPLITS = 2         # leading "parallel" grid axis (v7x has 2 TCs)


def _cdiv(a, b):
    return -(-a // b)


def _round_up(x, m):
    return ((x + m - 1) // m) * m


def _reduce_kernel(x_ref, sum_ref, max_ref, min_ref,
                   acc_sum, acc_max, acc_min, *, mask_total):
    """Streaming full-reduction over a (padded_rows, 128) array.

    Grid = (splits, steps): axis 0 is "parallel" (one row-range per
    TensorCore), axis 1 walks that range's tiles sequentially.  The (8, 128)
    VMEM accumulators persist across the sequential axis; the scalar outputs
    (one (1, 1) SMEM block per parallel slice) are written once, on the last
    step of each slice.
    """
    p = pl.program_id(0)
    i = pl.program_id(1)
    n = pl.num_programs(1)

    @pl.when(i == 0)
    def _init():
        acc_sum[...] = jnp.zeros_like(acc_sum)
        acc_max[...] = jnp.full_like(acc_max, -jnp.inf)
        acc_min[...] = jnp.full_like(acc_min, jnp.inf)

    tile = x_ref[...].astype(jnp.float32)          # (tile_rows, 128)
    tr, tc = tile.shape
    g = tr // 8

    if mask_total is None:
        # Exact fit: no padding anywhere -> no mask code generated at all.
        t_sum = t_max = t_min = tile
    else:
        # Padding exists (always at the flat tail). Replace padded lanes with
        # the neutral element of each reduction. Flat indices are int32, so
        # this path assumes < 2**31 elements per tensor.
        base = (p * n + i) * (tr * tc)
        ridx = jax.lax.broadcasted_iota(jnp.int32, (tr, tc), 0)
        cidx = jax.lax.broadcasted_iota(jnp.int32, (tr, tc), 1)
        valid = (base + ridx * tc + cidx) < mask_total
        t_sum = jnp.where(valid, tile, 0.0)
        t_max = jnp.where(valid, tile, -jnp.inf)
        t_min = jnp.where(valid, tile, jnp.inf)

    # Fold sublane groups into vreg-shaped (8, 128) partials: pure VPU
    # add/max/min per step, no cross-lane reduce, no scalar carry chain.
    acc_sum[...] = acc_sum[...] + jnp.sum(t_sum.reshape(g, 8, tc), axis=0)
    acc_max[...] = jnp.maximum(acc_max[...],
                               jnp.max(t_max.reshape(g, 8, tc), axis=0))
    acc_min[...] = jnp.minimum(acc_min[...],
                               jnp.min(t_min.reshape(g, 8, tc), axis=0))

    @pl.when(i == n - 1)
    def _finalize():
        # Single cross-lane reduce per parallel slice.
        sum_ref[0, 0] = jnp.sum(acc_sum[...])
        max_ref[0, 0] = jnp.max(acc_max[...])
        min_ref[0, 0] = jnp.min(acc_min[...])


@functools.partial(
    jax.jit,
    static_argnames=("total", "splits", "steps", "tile_rows", "padded_rows"))
def _stats_impl(x, *, total, splits, steps, tile_rows, padded_rows):
    flat = x.reshape(-1)                 # original dtype, no host upcast
    pad = padded_rows * LANES - total
    if pad:
        flat = jnp.pad(flat, (0, pad))
    mat = flat.reshape(padded_rows, LANES)

    kernel = functools.partial(
        _reduce_kernel, mask_total=(total if pad else None))

    in_spec = pl.BlockSpec((tile_rows, LANES), lambda p, i: (p * steps + i, 0))
    out_spec = pl.BlockSpec((1, 1), lambda p, i: (p, 0),
                            memory_space=pltpu.SMEM)
    part_shape = jax.ShapeDtypeStruct((splits, 1), jnp.float32)

    sums, maxs, mins = pl.pallas_call(
        kernel,
        out_shape=(part_shape, part_shape, part_shape),
        grid_spec=pltpu.PrefetchScalarGridSpec(
            num_scalar_prefetch=0,
            grid=(splits, steps),
            in_specs=[in_spec],
            out_specs=[out_spec, out_spec, out_spec],
            scratch_shapes=[
                pltpu.VMEM((8, LANES), jnp.float32),
                pltpu.VMEM((8, LANES), jnp.float32),
                pltpu.VMEM((8, LANES), jnp.float32),
            ],
        ),
        compiler_params=pltpu.CompilerParams(
            dimension_semantics=("parallel", "arbitrary")),
    )(mat)

    # Combine the per-TensorCore partials (tiny glue outside the kernel).
    s = jnp.sum(sums)
    mx = jnp.max(maxs)
    mn = jnp.min(mins)
    mean = s / jnp.float32(total)
    return s, mean, mx, mn


def reduce_stats(x):
    """sum / mean / max / min of one tensor, computed in a Pallas kernel."""
    total = int(x.size)
    if total == 0:
        raise ValueError("reduce_stats: empty tensor (max/min undefined).")

    rows = _cdiv(total, LANES)
    splits = 1 if rows <= MAX_TILE_ROWS else NUM_CORE_SPLITS
    steps = _cdiv(rows, splits * MAX_TILE_ROWS)
    tile_rows = _round_up(_cdiv(rows, splits * steps), 8)
    padded_rows = splits * steps * tile_rows

    s, mean, mx, mn = _stats_impl(
        x, total=total, splits=splits, steps=steps,
        tile_rows=tile_rows, padded_rows=padded_rows)
    return {"sum": s, "mean": mean, "max": mx, "min": mn}


def pt_module_forward(inputs):
    """Mirror of PtModule.forward: list of tensors -> list of stat dicts."""
    # Note: one pallas_call per tensor. For workloads with many tiny tensors,
    # launch overhead dominates; fusing them into one padded concatenated
    # buffer with a scalar-prefetched offset table would amortize it.
    return [reduce_stats(t) for t in inputs]


if __name__ == "__main__":
    key = jax.random.PRNGKey(0)
    k1, k2, k3 = jax.random.split(key, 3)

    # Small deterministic example inputs (a list, like the PyTorch module takes).
    inputs = [
        jax.random.normal(k1, (2, 4, 16, 16), dtype=jnp.float32),  # 2048 elems
        jax.random.normal(k2, (8, 32), dtype=jnp.float32),         # 256 elems
        jax.random.normal(k3, (4, 8, 16), dtype=jnp.float32),      # 512 elems
    ]

    results = pt_module_forward(inputs)
    for r in results:
        for v in r.values():
            jax.block_until_ready(v)

    # Verify against plain-JAX reference.
    ok = True
    for x, r in zip(inputs, results):
        ok &= bool(jnp.allclose(r["sum"], jnp.sum(x), rtol=1e-5, atol=1e-4))
        ok &= bool(jnp.allclose(r["mean"], jnp.mean(x), rtol=1e-5, atol=1e-5))
        ok &= bool(jnp.allclose(r["max"], jnp.max(x)))
        ok &= bool(jnp.allclose(r["min"], jnp.min(x)))

    if ok:
        print("KERNEL_OK")
    else:
        print("KERNEL_MISMATCH")
</pallas_src>

<mosaic_0001>
module attributes {stable_mosaic.version = 11 : i64} {
  func.func @_reduce_kernel(%arg0: i32, %arg1: i32, %arg2: memref<16x128xf32, #tpu.memory_space<vmem>>, %arg3: memref<1x1xf32, #tpu.memory_space<smem>>, %arg4: memref<1x1xf32, #tpu.memory_space<smem>>, %arg5: memref<1x1xf32, #tpu.memory_space<smem>>, %arg6: memref<8x128xf32, #tpu.memory_space<vmem>>, %arg7: memref<8x128xf32, #tpu.memory_space<vmem>>, %arg8: memref<8x128xf32, #tpu.memory_space<vmem>>) attributes {dimension_semantics = [#tpu.dimension_semantics<parallel>, #tpu.dimension_semantics<arbitrary>], iteration_bounds = array<i64: 1, 1>, scalar_prefetch = 0 : i64, scratch_operands = 3 : i64, tpu.core_type = #tpu.core_type<tc>, window_params = [{transform_indices = @transform_0, window_bounds = array<i64: 16, 128>}, {transform_indices = @transform_1, window_bounds = array<i64: 1, 1>}, {transform_indices = @transform_2, window_bounds = array<i64: 1, 1>}, {transform_indices = @transform_3, window_bounds = array<i64: 1, 1>}]} {
    %c0_i32 = arith.constant 0 : i32
    %0 = arith.cmpi eq, %arg1, %c0_i32 : i32
    %1 = arith.extui %0 : i1 to i32
    %c0_i32_0 = arith.constant 0 : i32
    %2 = arith.cmpi ne, %1, %c0_i32_0 : i32
    scf.if %2 {
      %cst_18 = arith.constant 0.000000e+00 : f32
      %22 = vector.broadcast %cst_18 : f32 to vector<8x128xf32>
      %c0_19 = arith.constant 0 : index
      %c0_20 = arith.constant 0 : index
      %23 = vector.load %arg6[%c0_19, %c0_20] : memref<8x128xf32, #tpu.memory_space<vmem>>, vector<8x128xf32>
      tpu.vector_store %arg6[%c0_19, %c0_20], %22 {strides = array<i32>} : memref<8x128xf32, #tpu.memory_space<vmem>>, vector<8x128xf32>,
      %cst_21 = arith.constant 0xFF800000 : f32
      %24 = vector.broadcast %cst_21 : f32 to vector<8x128xf32>
      %c0_22 = arith.constant 0 : index
      %c0_23 = arith.constant 0 : index
      %25 = vector.load %arg7[%c0_22, %c0_23] : memref<8x128xf32, #tpu.memory_space<vmem>>, vector<8x128xf32>
      tpu.vector_store %arg7[%c0_22, %c0_23], %24 {strides = array<i32>} : memref<8x128xf32, #tpu.memory_space<vmem>>, vector<8x128xf32>,
      %cst_24 = arith.constant 0x7F800000 : f32
      %26 = vector.broadcast %cst_24 : f32 to vector<8x128xf32>
      %c0_25 = arith.constant 0 : index
      %c0_26 = arith.constant 0 : index
      %27 = vector.load %arg8[%c0_25, %c0_26] : memref<8x128xf32, #tpu.memory_space<vmem>>, vector<8x128xf32>
      tpu.vector_store %arg8[%c0_25, %c0_26], %26 {strides = array<i32>} : memref<8x128xf32, #tpu.memory_space<vmem>>, vector<8x128xf32>,
    } else {
    }
    %c0 = arith.constant 0 : index
    %c0_1 = arith.constant 0 : index
    %3 = vector.load %arg2[%c0, %c0_1] : memref<16x128xf32, #tpu.memory_space<vmem>>, vector<16x128xf32>
    %c0_2 = arith.constant 0 : index
    %c0_3 = arith.constant 0 : index
    %4 = vector.load %arg6[%c0_2, %c0_3] : memref<8x128xf32, #tpu.memory_space<vmem>>, vector<8x128xf32>
    %5 = vector.shape_cast %3 : vector<16x128xf32> to vector<2x8x128xf32>
    %cst = arith.constant dense<0.000000e+00> : vector<8x128xf32>
    %6 = vector.multi_reduction <add>, %5, %cst [0] : vector<2x8x128xf32> to vector<8x128xf32>
    %7 = arith.addf %4, %6 : vector<8x128xf32>
    %c0_4 = arith.constant 0 : index
    %c0_5 = arith.constant 0 : index
    %8 = vector.load %arg6[%c0_4, %c0_5] : memref<8x128xf32, #tpu.memory_space<vmem>>, vector<8x128xf32>
    tpu.vector_store %arg6[%c0_4, %c0_5], %7 {strides = array<i32>} : memref<8x128xf32, #tpu.memory_space<vmem>>, vector<8x128xf32>,
    %c0_6 = arith.constant 0 : index
    %c0_7 = arith.constant 0 : index
    %9 = vector.load %arg7[%c0_6, %c0_7] : memref<8x128xf32, #tpu.memory_space<vmem>>, vector<8x128xf32>
    %10 = vector.shape_cast %3 : vector<16x128xf32> to vector<2x8x128xf32>
    %cst_8 = arith.constant dense<0xFF800000> : vector<8x128xf32>
    %11 = vector.multi_reduction <maximumf>, %10, %cst_8 [0] : vector<2x8x128xf32> to vector<8x128xf32>
    %12 = arith.maximumf %9, %11 : vector<8x128xf32>
    %c0_9 = arith.constant 0 : index
    %c0_10 = arith.constant 0 : index
    %13 = vector.load %arg7[%c0_9, %c0_10] : memref<8x128xf32, #tpu.memory_space<vmem>>, vector<8x128xf32>
    tpu.vector_store %arg7[%c0_9, %c0_10], %12 {strides = array<i32>} : memref<8x128xf32, #tpu.memory_space<vmem>>, vector<8x128xf32>,
    %c0_11 = arith.constant 0 : index
    %c0_12 = arith.constant 0 : index
    %14 = vector.load %arg8[%c0_11, %c0_12] : memref<8x128xf32, #tpu.memory_space<vmem>>, vector<8x128xf32>
    %15 = vector.shape_cast %3 : vector<16x128xf32> to vector<2x8x128xf32>
    %cst_13 = arith.constant dense<0x7F800000> : vector<8x128xf32>
    %16 = vector.multi_reduction <minimumf>, %15, %cst_13 [0] : vector<2x8x128xf32> to vector<8x128xf32>
    %17 = arith.minimumf %14, %16 : vector<8x128xf32>
    %c0_14 = arith.constant 0 : index
    %c0_15 = arith.constant 0 : index
    %18 = vector.load %arg8[%c0_14, %c0_15] : memref<8x128xf32, #tpu.memory_space<vmem>>, vector<8x128xf32>
    tpu.vector_store %arg8[%c0_14, %c0_15], %17 {strides = array<i32>} : memref<8x128xf32, #tpu.memory_space<vmem>>, vector<8x128xf32>,
    %c0_i32_16 = arith.constant 0 : i32
    %19 = arith.cmpi eq, %arg1, %c0_i32_16 : i32
    %20 = arith.extui %19 : i1 to i32
    %c0_i32_17 = arith.constant 0 : i32
    %21 = arith.cmpi ne, %20, %c0_i32_17 : i32
    scf.if %21 {
      %c0_18 = arith.constant 0 : index
      %c0_19 = arith.constant 0 : index
      %22 = vector.load %arg6[%c0_18, %c0_19] : memref<8x128xf32, #tpu.memory_space<vmem>>, vector<8x128xf32>
      %23 = vector.shape_cast %22 : vector<8x128xf32> to vector<1x8x128xf32>
      %cst_20 = arith.constant dense<0.000000e+00> : vector<1xf32>
      %24 = vector.multi_reduction <add>, %23, %cst_20 [1, 2] : vector<1x8x128xf32> to vector<1xf32>
      %25 = vector.shape_cast %24 : vector<1xf32> to vector<1x1x1xf32>
      %26 = vector.extract %25[0, 0, 0] : f32 from vector<1x1x1xf32>
      %c0_21 = arith.constant 0 : index
      %c0_22 = arith.constant 0 : index
      %27 = memref.load %arg3[%c0_21, %c0_22] : memref<1x1xf32, #tpu.memory_space<smem>>
      memref.store %26, %arg3[%c0_21, %c0_22] : memref<1x1xf32, #tpu.memory_space<smem>>
      %c0_23 = arith.constant 0 : index
      %c0_24 = arith.constant 0 : index
      %28 = vector.load %arg7[%c0_23, %c0_24] : memref<8x128xf32, #tpu.memory_space<vmem>>, vector<8x128xf32>
      %29 = vector.shape_cast %28 : vector<8x128xf32> to vector<1x8x128xf32>
      %cst_25 = arith.constant dense<0xFF800000> : vector<1xf32>
      %30 = vector.multi_reduction <maximumf>, %29, %cst_25 [1, 2] : vector<1x8x128xf32> to vector<1xf32>
      %31 = vector.shape_cast %30 : vector<1xf32> to vector<1x1x1xf32>
      %32 = vector.extract %31[0, 0, 0] : f32 from vector<1x1x1xf32>
      %c0_26 = arith.constant 0 : index
      %c0_27 = arith.constant 0 : index
      %33 = memref.load %arg4[%c0_26, %c0_27] : memref<1x1xf32, #tpu.memory_space<smem>>
      memref.store %32, %arg4[%c0_26, %c0_27] : memref<1x1xf32, #tpu.memory_space<smem>>
      %c0_28 = arith.constant 0 : index
      %c0_29 = arith.constant 0 : index
      %34 = vector.load %arg8[%c0_28, %c0_29] : memref<8x128xf32, #tpu.memory_space<vmem>>, vector<8x128xf32>
      %35 = vector.shape_cast %34 : vector<8x128xf32> to vector<1x8x128xf32>
      %cst_30 = arith.constant dense<0x7F800000> : vector<1xf32>
      %36 = vector.multi_reduction <minimumf>, %35, %cst_30 [1, 2] : vector<1x8x128xf32> to vector<1xf32>
      %37 = vector.shape_cast %36 : vector<1xf32> to vector<1x1x1xf32>
      %38 = vector.extract %37[0, 0, 0] : f32 from vector<1x1x1xf32>
      %c0_31 = arith.constant 0 : index
      %c0_32 = arith.constant 0 : index
      %39 = memref.load %arg5[%c0_31, %c0_32] : memref<1x1xf32, #tpu.memory_space<smem>>
      memref.store %38, %arg5[%c0_31, %c0_32] : memref<1x1xf32, #tpu.memory_space<smem>>
    } else {
    }
    return
  }
  func.func @transform_0(%arg0: i32, %arg1: i32) -> (i32, i32) {
    %c1_i32 = arith.constant 1 : i32
    %0 = arith.muli %arg0, %c1_i32 : i32
    %1 = arith.addi %0, %arg1 : i32
    %c0_i32 = arith.constant 0 : i32
    %c0_i32_0 = arith.constant 0 : i32
    return %1, %c0_i32 : i32, i32
  }
  func.func @transform_1(%arg0: i32, %arg1: i32) -> (i32, i32) {
    %c0_i32 = arith.constant 0 : i32
    %c0_i32_0 = arith.constant 0 : i32
    return %arg0, %c0_i32 : i32, i32
  }
  func.func @transform_2(%arg0: i32, %arg1: i32) -> (i32, i32) {
    %c0_i32 = arith.constant 0 : i32
    %c0_i32_0 = arith.constant 0 : i32
    return %arg0, %c0_i32 : i32, i32
  }
  func.func @transform_3(%arg0: i32, %arg1: i32) -> (i32, i32) {
    %c0_i32 = arith.constant 0 : i32
    %c0_i32_0 = arith.constant 0 : i32
    return %arg0, %c0_i32 : i32, i32
  }
}

</mosaic_0001>

<bundles_post_ra>
// kernel: _stats_impl.1
= control target key start
LH: loop header
LB: loop body
LE: loop exit
PB: predicated region body
PF: predicated region fallthrough
CT: control target
= control target key end

     0   :  { %9 = vsyncpa [#allocation6], 0  ;;  %s230_s0 = inlined_call_operand.vmem [shape: f32[16,128], index: 0, kind: input, shape index: {}]   ;;  %s231_s1 = inlined_call_operand.hbm [shape: f32[1,1], index: 1, kind: output, shape index: {0}]   ;;  %s232_s2 = inlined_call_operand.hbm [shape: f32[1,1], index: 2, kind: output, shape index: {1}]   ;;  %s233_s3 = inlined_call_operand.hbm [shape: f32[1,1], index: 3, kind: output, shape index: {2}]  }
   0x1   :  { %v42_v0 = vld [vmem:[%s230_s0] sm:$0xff]  ;;  %v43_v1 = vld [vmem:[%s230_s0 + $0x8] sm:$0xff] }
   0x2   :  { %10 = vsyncpa [#allocation8], 0  ;;  %v45_v2 = vadd.f32 %v43_v1, %v42_v0  ;;  %v53_v3 = vmin.f32 %v42_v0, %v43_v1  ;;  %v49_v4 = vmax.f32 %v42_v0, %v43_v1  ;;  %s100_s17 = sshll.u32 %s231_s1, 4  ;;  %s192_s19 = smov [#allocation5]   ;;  %s101_s17 = int_to_ptr.hbm [resolvable:$true] %s100_s17 }
   0x3   :  { %s109_s22 = sshll.u32 %s232_s2, 4  ;;  %s118_s25 = sshll.u32 %s233_s3, 4  ;;  %s110_s22 = int_to_ptr.hbm [resolvable:$true] %s109_s22  ;;  %s119_s25 = int_to_ptr.hbm [resolvable:$true] %s118_s25 }
   0x4   :  { %60 = vadd.xlane.f32.xlu0 %v45_v2  ;;  %84 = vmin.xlane.f32.xlu1 %v53_v3  ;;  %s193_s1 = smov [#allocation7]   ;;  %s194_s28 = smov [#allocation9]  }
   0xc   :  { %72 = vmax.xlane.f32.xlu0 %v49_v4 }
  0x77   :  { %v61_v5 = vpop.xlane.xlu0 %60  ;;  %v85_v6 = vpop.xlane.xlu1 %84 }
  0x78   :  { %v62_v7 = vrot.slane %v61_v5, 4  ;;  %v86_v8 = vrot.slane %v85_v6, 4 }
  0x7a   :  { %v63_v9 = vadd.f32 %v62_v7, %v61_v5  ;;  %v87_v10 = vmin.f32 %v85_v6, %v86_v8 }
  0x7c   :  { %v64_v11 = vrot.slane %v63_v9, 2  ;;  %v88_v13 = vrot.slane %v87_v10, 2 }
  0x7e   :  { %v65_v12 = vadd.f32 %v64_v11, %v63_v9  ;;  %v89_v19 = vmin.f32 %v87_v10, %v88_v13 }
  0x7f   :  { %v73_v14 = vpop.xlane.xlu0 %72 }
  0x80   :  { %v74_v15 = vrot.slane %v73_v14, 4  ;;  %v66_v16 = vrot.slane %v65_v12, 1  ;;  %v90_v22 = vrot.slane %v89_v19, 1 }
  0x82   :  { %v75_v17 = vmax.f32 %v73_v14, %v74_v15  ;;  %v67_v18 = vadd.f32 %v66_v16, %v65_v12  ;;  %v91_v25 = vmin.f32 %v89_v19, %v90_v22 }
  0x84   :  { %v76_v20 = vrot.slane %v75_v17, 2  ;;  %143 = vpush %v67_v18 }
  0x86   :  { %v77_v21 = vmax.f32 %v75_v17, %v76_v20 }
  0x88   :  { %v78_v23 = vrot.slane %v77_v21, 1 }
  0x8a   :  { %v79_v24 = vmax.f32 %v77_v21, %v78_v23 }
  0x8c   :  { %145 = vpush %v79_v24 }
  0x8d   :  { %147 = vpush %v91_v25 }
  0xb5   :  { %s144_s18 = spop %143 }
  0xb6   :  { %70 = sst [smem:[#allocation5]] %s144_s18 }
  0xb7   :  { %103 = dma.smem_to_hbm %s192_s19, 16, %s101_s17, [#allocation6]  }
  0xbd   :  { %s146_s26 = spop %145 }
  0xbe   :  { %82 = sst [smem:[#allocation7]] %s146_s26  ;;  %s148_s27 = spop %147 }
  0xbf   :  { %94 = sst [smem:[#allocation9]] %s148_s27 }
  0xc0   :  { %112 = dma.smem_to_hbm %s193_s1, 16, %s110_s22, [#allocation8]  }
  0xc1   :  { %121 = dma.smem_to_hbm %s194_s28, 16, %s119_s25, [#allocation8]  }
  0xc2   :  { %188 = dma.done.wait [#allocation6], 16  }
  0xc3   :  { %189 = vsyncadd [#allocation6], 4294967280 }
  0xc4   :  { %190 = dma.done.wait [#allocation8], 32  }
  0xc5   :  { %191 = vsyncadd [#allocation8], 4294967264 }
  0xc6   :  { %134 = sfence }
  0xc7   :  { %135 = vsyncpa [#allocation6], 1 }
  0xc8   :  { %136 = vsyncpa [#allocation8], 1 }

</bundles_post_ra>
